<compile_context>
chip_gen: v7x
topology: tpu7x:2x2x1
jax: 0.10.0
libtpu: 0.0.40
codegen_flags: <defaults>
</compile_context>

<pallas_src>
import functools

import jax
import jax.numpy as jnp
from jax import lax
from jax.experimental import pallas as pl
from jax.experimental.pallas import tpu as pltpu


def _vmem_capacity_bytes():
    try:
        return int(pltpu.get_tpu_info().vmem_capacity_bytes)
    except Exception:
        return 64 * 2**20  # conservative fallback


def select_tiles(T, H, I, x_dtype, w_dtype):
    """Generation-aware default (tm, ti)."""
    vmem_cap = _vmem_capacity_bytes()
    x_isz = jnp.dtype(x_dtype).itemsize
    w_isz = jnp.dtype(w_dtype).itemsize

    # Token tile: decode-sized T -> 128; prefill -> larger, since all weight bytes are
    # re-streamed from HBM once per tm tokens (arithmetic intensity ~ tm flop/byte).
    if T <= 128:
        tm = 128
    elif vmem_cap >= 96 * 2**20:      # v5e / v6e (128 MiB per-core VMEM)
        tm = 512 if T >= 512 else 256
    else:                             # v7x (64 MiB per-core VMEM)
        tm = 256

    # I tile: biggest lane-aligned divisor of I whose double-buffered working set stays
    # within ~60% of VMEM (headroom for compiler scratch).
    budget = int(0.6 * vmem_cap)
    cands = [c for c in (2048, 1024, 512, 256, 128) if I % c == 0] or [I]
    ti = cands[-1]
    for c in cands:
        need = (2 * (tm * H * x_isz                 # x tile (double-buffered)
                     + tm * H * x_isz               # out tile
                     + 2 * c * H * w_isz            # fused gate+up tile
                     + c * H * w_isz)               # down tile
                + tm * H * 4)                       # fp32 accumulator
        if need <= budget:
            ti = c
            break
    return tm, ti


def prepare_cohere_mlp_weights(w_gate, w_up, w_down, *, ti, dtype=None):
    """One-time (load-time) weight repack.

    w_gate, w_up: [I, H] torch Linear layout [out_features, in_features]
    w_down:       [H, I]
    Returns:
      w_gu:     [2*I, H]  per-I-tile blocks of [ti gate rows ; ti up rows]
      w_down_t: [I, H]    down_proj pre-transposed -> row-contiguous (ti, H) tiles and
                          canonical [K, N] MXU feed.
    """
    I, H = w_gate.shape
    assert w_up.shape == (I, H) and w_down.shape == (H, I)
    assert I % ti == 0
    n = I // ti
    w_gu = jnp.concatenate(
        [w_gate.reshape(n, ti, H), w_up.reshape(n, ti, H)], axis=1
    ).reshape(2 * I, H)
    w_down_t = w_down.T
    if dtype is not None:  # e.g. jnp.bfloat16 for serving (halves weight HBM traffic)
        w_gu = w_gu.astype(dtype)
        w_down_t = w_down_t.astype(dtype)
    return w_gu, w_down_t


def _cohere_mlp_kernel(x_ref, wgu_ref, wd_ref, o_ref, acc_ref, *, ti):
    # x_ref  : (tm, H)    token tile (same block across the I axis)
    # wgu_ref: (2*ti, H)  rows [0:ti] = gate_proj rows, [ti:2ti] = up_proj rows
    # wd_ref : (ti, H)    down_proj pre-transposed (canonical [K, N] tile)
    # o_ref  : (tm, H)    output tile (resident across the I reduction axis)
    # acc_ref: (tm, H)    fp32 accumulator scratch
    k = pl.program_id(1)
    x = x_ref[...]

    # Fused gate/up: one MXU pass per x tile, contracting the shared hidden dim
    # (minor dim of both operands, i.e. x @ W.T -- no weight transposes).
    dn_t = (((1,), (1,)), ((), ()))
    gu = lax.dot_general(x, wgu_ref[...], dn_t, preferred_element_type=jnp.float32)
    gate = gu[:, :ti]          # lane-aligned slice (ti % 128 == 0 or ti == I)
    up = gu[:, ti:]

    # SiLU(gate) * up in fp32 (sigmoid runs on the EUP slot).
    hidden = (gate * jax.nn.sigmoid(gate)) * up                      # (tm, ti)

    # Partial down-projection for this I-tile: (tm, ti) @ (ti, H), canonical MXU feed.
    dn_nt = (((1,), (0,)), ((), ()))
    part = lax.dot_general(hidden.astype(wd_ref.dtype), wd_ref[...], dn_nt,
                           preferred_element_type=jnp.float32)

    @pl.when(k == 0)
    def _():
        acc_ref[...] = part            # first partial written directly (no zero+RMW)

    @pl.when(k != 0)
    def _():
        acc_ref[...] += part

    @pl.when(k == pl.num_programs(1) - 1)
    def _():
        o_ref[...] = acc_ref[...].astype(o_ref.dtype)


@functools.partial(jax.jit, static_argnames=("tm", "ti"))
def cohere_mlp(x, w_gu, w_down_t, *, tm, ti):
    """CohereMLP forward.

    x:        [T, H]   tokens (bf16 recommended for serving)
    w_gu:     [2*I, H] packed gate/up weights from prepare_cohere_mlp_weights(ti=ti)
    w_down_t: [I, H]   pre-transposed down_proj
    """
    T, H = x.shape
    I = w_down_t.shape[0]
    assert w_gu.shape == (2 * I, H) and w_down_t.shape == (I, H)
    assert I % ti == 0, "intermediate_size must be a multiple of the I-tile"
    assert ti == I or ti % 128 == 0, "I-tile must be lane-aligned (multiple of 128)"

    # Keep matmul operands in one dtype (cast x once; weights were cast at load time).
    if x.dtype != w_gu.dtype:
        x = x.astype(w_gu.dtype)
    out_dtype = x.dtype
    x_isz = x.dtype.itemsize
    w_isz = w_gu.dtype.itemsize

    # Pad tokens to a tile multiple (padded rows are zero: SiLU(0)*0 == 0) and slice off.
    T_pad = pl.cdiv(T, tm) * tm
    if T_pad != T:
        x = jnp.pad(x, ((0, T_pad - T), (0, 0)))

    n_tok_tiles = T_pad // tm
    grid = (n_tok_tiles, I // ti)

    # Advisory cost estimate (weights are re-streamed once per token tile).
    flops = 6 * T_pad * H * I                       # 3 GEMMs x 2 flops/MAC
    transcendentals = T_pad * I                     # sigmoid in SiLU
    weight_bytes = (w_gu.size + w_down_t.size) * w_isz
    bytes_accessed = (T_pad * H * x_isz             # x read
                      + n_tok_tiles * weight_bytes  # weight streaming per token tile
                      + T_pad * H * x_isz)          # out write
    cost = pl.CostEstimate(flops=flops, transcendentals=transcendentals,
                           bytes_accessed=bytes_accessed)

    # Exact double-buffered working-set + headroom, capped by physical VMEM.
    vmem_cap = _vmem_capacity_bytes()
    x_tile = tm * H * x_isz
    out_tile = tm * H * out_dtype.itemsize
    wgu_tile = 2 * ti * H * w_isz
    wd_tile = ti * H * w_isz
    acc_bytes = tm * H * 4
    exact = 2 * (x_tile + wgu_tile + wd_tile + out_tile) + acc_bytes
    vmem_limit = max(32 * 2**20, exact + 8 * 2**20)           # compiler-scratch headroom
    vmem_limit = min(vmem_limit, max(32 * 2**20, vmem_cap - 4 * 2**20))

    out = pl.pallas_call(
        functools.partial(_cohere_mlp_kernel, ti=ti),
        out_shape=jax.ShapeDtypeStruct((T_pad, H), out_dtype),
        grid_spec=pltpu.PrefetchScalarGridSpec(
            num_scalar_prefetch=0,
            grid=grid,
            in_specs=[
                pl.BlockSpec((tm, H), lambda i, k: (i, 0)),      # x tile
                pl.BlockSpec((2 * ti, H), lambda i, k: (k, 0)),  # fused gate+up rows
                pl.BlockSpec((ti, H), lambda i, k: (k, 0)),      # down_proj (pre-transposed)
            ],
            out_specs=pl.BlockSpec((tm, H), lambda i, k: (i, 0)),
            scratch_shapes=[pltpu.VMEM((tm, H), jnp.float32)],
        ),
        compiler_params=pltpu.CompilerParams(
            dimension_semantics=("parallel", "arbitrary"),
            vmem_limit_bytes=int(vmem_limit),
        ),
        cost_estimate=cost,
    )(x, w_gu, w_down_t)

    return out[:T]


def cohere_mlp_reference(x, w_gate, w_up, w_down):
    """Pure-JAX reference matching the PyTorch module (concat -> view(-1, 2, I))."""
    w_gate_up = jnp.concatenate([w_gate, w_up], axis=0)                  # [2I, H]
    gate_up = jnp.dot(x, w_gate_up.T, precision=lax.Precision.HIGHEST)   # [T, 2I]
    I = w_gate.shape[0]
    gate_up = gate_up.reshape(-1, 2, I)
    gate, up = gate_up[:, 0], gate_up[:, 1]
    act = gate * jax.nn.sigmoid(gate)                                    # SiLU
    return jnp.dot(act * up, w_down.T, precision=lax.Precision.HIGHEST)


if __name__ == "__main__":
    # Small shapes consistent with the module. T is deliberately NOT a multiple of the
    # token tile (exercises the pad path) and I spans two I-tiles in the first run
    # (exercises the reduction accumulator).
    T, H, I = 16, 128, 256
    key = jax.random.PRNGKey(0)
    kx, kg, ku, kd = jax.random.split(key, 4)

    x = jax.random.normal(kx, (T, H), dtype=jnp.float32)
    # Weights in PyTorch Linear layout [out_features, in_features].
    w_gate = jax.random.normal(kg, (I, H), dtype=jnp.float32) * 0.05
    w_up = jax.random.normal(ku, (I, H), dtype=jnp.float32) * 0.05
    w_down = jax.random.normal(kd, (H, I), dtype=jnp.float32) * 0.05

    ref = cohere_mlp_reference(x, w_gate, w_up, w_down)

    # Run 1: explicit small tiles -> two I-tiles -> exercises the fp32 accumulator path.
    tm, ti = 128, 128
    w_gu, w_down_t = prepare_cohere_mlp_weights(w_gate, w_up, w_down, ti=ti)
    out = jax.block_until_ready(cohere_mlp(x, w_gu, w_down_t, tm=tm, ti=ti))
    assert out.shape == (T, H)
    assert jnp.allclose(out, ref, atol=1e-3, rtol=1e-3), "mismatch vs reference (run 1)"

    # Run 2: generation-aware auto tiles (single I-tile at this toy size).
    tm2, ti2 = select_tiles(T, H, I, x.dtype, w_gate.dtype)
    w_gu2, w_down_t2 = prepare_cohere_mlp_weights(w_gate, w_up, w_down, ti=ti2)
    out2 = jax.block_until_ready(cohere_mlp(x, w_gu2, w_down_t2, tm=tm2, ti=ti2))
    assert jnp.allclose(out2, ref, atol=1e-3, rtol=1e-3), "mismatch vs reference (run 2)"

    print("KERNEL_OK")
</pallas_src>

<mosaic_0001>
module attributes {stable_mosaic.version = 11 : i64} {
  func.func @_cohere_mlp_kernel(%arg0: i32, %arg1: i32, %arg2: memref<128x128xf32, #tpu.memory_space<vmem>>, %arg3: memref<256x128xf32, #tpu.memory_space<vmem>>, %arg4: memref<128x128xf32, #tpu.memory_space<vmem>>, %arg5: memref<128x128xf32, #tpu.memory_space<vmem>>, %arg6: memref<128x128xf32, #tpu.memory_space<vmem>>) attributes {dimension_semantics = [#tpu.dimension_semantics<parallel>, #tpu.dimension_semantics<arbitrary>], iteration_bounds = array<i64: 1, 2>, scalar_prefetch = 0 : i64, scratch_operands = 1 : i64, tpu.core_type = #tpu.core_type<tc>, window_params = [{transform_indices = @transform_0, window_bounds = array<i64: 128, 128>}, {transform_indices = @transform_1, window_bounds = array<i64: 256, 128>}, {transform_indices = @transform_2, window_bounds = array<i64: 128, 128>}, {transform_indices = @transform_3, window_bounds = array<i64: 128, 128>}]} {
    %c0 = arith.constant 0 : index
    %c0_0 = arith.constant 0 : index
    %0 = vector.load %arg2[%c0, %c0_0] : memref<128x128xf32, #tpu.memory_space<vmem>>, vector<128x128xf32>
    %c0_1 = arith.constant 0 : index
    %c0_2 = arith.constant 0 : index
    %1 = vector.load %arg3[%c0_1, %c0_2] : memref<256x128xf32, #tpu.memory_space<vmem>>, vector<256x128xf32>
    %cst = arith.constant dense<0.000000e+00> : vector<128x256xf32>
    %2 = tpu.matmul %0, %1, %cst {dimension_numbers = #tpu.dot_dimension_numbers<[1], [1], [0], [0], [0, 0, 1, 0], [], []>} : vector<128x128xf32>, vector<256x128xf32>, vector<128x256xf32> -> vector<128x256xf32>
    %3 = vector.extract_strided_slice %2 {offsets = [0, 0], sizes = [128, 128], strides = [1, 1]} : vector<128x256xf32> to vector<128x128xf32>
    %4 = vector.extract_strided_slice %2 {offsets = [0, 128], sizes = [128, 128], strides = [1, 1]} : vector<128x256xf32> to vector<128x128xf32>
    %5 = arith.negf %3 : vector<128x128xf32>
    %6 = math.exp %5 : vector<128x128xf32>
    %cst_3 = arith.constant 1.000000e+00 : f32
    %7 = vector.broadcast %cst_3 : f32 to vector<128x128xf32>
    %8 = arith.addf %7, %6 : vector<128x128xf32>
    %9 = arith.divf %7, %8 : vector<128x128xf32>
    %10 = arith.mulf %3, %9 : vector<128x128xf32>
    %11 = arith.mulf %10, %4 : vector<128x128xf32>
    %c0_4 = arith.constant 0 : index
    %c0_5 = arith.constant 0 : index
    %12 = vector.load %arg4[%c0_4, %c0_5] : memref<128x128xf32, #tpu.memory_space<vmem>>, vector<128x128xf32>
    %cst_6 = arith.constant dense<0.000000e+00> : vector<128x128xf32>
    %13 = tpu.matmul %11, %12, %cst_6 {dimension_numbers = #tpu.dot_dimension_numbers<[1], [0], [0], [1], [0, 0, 1, 1], [], []>} : vector<128x128xf32>, vector<128x128xf32>, vector<128x128xf32> -> vector<128x128xf32>
    %c0_i32 = arith.constant 0 : i32
    %14 = arith.cmpi eq, %arg1, %c0_i32 : i32
    %15 = arith.extui %14 : i1 to i32
    %c0_i32_7 = arith.constant 0 : i32
    %16 = arith.cmpi ne, %15, %c0_i32_7 : i32
    scf.if %16 {
      %c0_11 = arith.constant 0 : index
      %c0_12 = arith.constant 0 : index
      %23 = vector.load %arg6[%c0_11, %c0_12] : memref<128x128xf32, #tpu.memory_space<vmem>>, vector<128x128xf32>
      tpu.vector_store %arg6[%c0_11, %c0_12], %13 {strides = array<i32>} : memref<128x128xf32, #tpu.memory_space<vmem>>, vector<128x128xf32>,
    } else {
    }
    %c0_i32_8 = arith.constant 0 : i32
    %17 = arith.cmpi ne, %arg1, %c0_i32_8 : i32
    %18 = arith.extui %17 : i1 to i32
    %c0_i32_9 = arith.constant 0 : i32
    %19 = arith.cmpi ne, %18, %c0_i32_9 : i32
    scf.if %19 {
      %c0_11 = arith.constant 0 : index
      %c0_12 = arith.constant 0 : index
      %23 = vector.load %arg6[%c0_11, %c0_12] : memref<128x128xf32, #tpu.memory_space<vmem>>, vector<128x128xf32>
      %24 = arith.addf %23, %13 : vector<128x128xf32>
      %c0_13 = arith.constant 0 : index
      %c0_14 = arith.constant 0 : index
      %25 = vector.load %arg6[%c0_13, %c0_14] : memref<128x128xf32, #tpu.memory_space<vmem>>, vector<128x128xf32>
      tpu.vector_store %arg6[%c0_13, %c0_14], %24 {strides = array<i32>} : memref<128x128xf32, #tpu.memory_space<vmem>>, vector<128x128xf32>,
    } else {
    }
    %c1_i32 = arith.constant 1 : i32
    %20 = arith.cmpi eq, %arg1, %c1_i32 : i32
    %21 = arith.extui %20 : i1 to i32
    %c0_i32_10 = arith.constant 0 : i32
    %22 = arith.cmpi ne, %21, %c0_i32_10 : i32
    scf.if %22 {
      %c0_11 = arith.constant 0 : index
      %c0_12 = arith.constant 0 : index
      %23 = vector.load %arg6[%c0_11, %c0_12] : memref<128x128xf32, #tpu.memory_space<vmem>>, vector<128x128xf32>
      %c0_13 = arith.constant 0 : index
      %c0_14 = arith.constant 0 : index
      %24 = vector.load %arg5[%c0_13, %c0_14] : memref<128x128xf32, #tpu.memory_space<vmem>>, vector<128x128xf32>
      tpu.vector_store %arg5[%c0_13, %c0_14], %23 {strides = array<i32>} : memref<128x128xf32, #tpu.memory_space<vmem>>, vector<128x128xf32>,
    } else {
    }
    return
  }
  func.func @transform_0(%arg0: i32, %arg1: i32) -> (i32, i32) {
    %c0_i32 = arith.constant 0 : i32
    %c0_i32_0 = arith.constant 0 : i32
    return %arg0, %c0_i32 : i32, i32
  }
  func.func @transform_1(%arg0: i32, %arg1: i32) -> (i32, i32) {
    %c0_i32 = arith.constant 0 : i32
    %c0_i32_0 = arith.constant 0 : i32
    return %arg1, %c0_i32 : i32, i32
  }
  func.func @transform_2(%arg0: i32, %arg1: i32) -> (i32, i32) {
    %c0_i32 = arith.constant 0 : i32
    %c0_i32_0 = arith.constant 0 : i32
    return %arg1, %c0_i32 : i32, i32
  }
  func.func @transform_3(%arg0: i32, %arg1: i32) -> (i32, i32) {
    %c0_i32 = arith.constant 0 : i32
    %c0_i32_0 = arith.constant 0 : i32
    return %arg0, %c0_i32 : i32, i32
  }
}

</mosaic_0001>

<bundles_post_ra>
// kernel: cohere_mlp.1
= control target key start
LH: loop header
LB: loop body
LE: loop exit
PB: predicated region body
PF: predicated region fallthrough
CT: control target
= control target key end

     0   :  { %8 = vsyncpa [#allocation4], 0  ;;  %s1889_s0 = inlined_call_operand.vmem [shape: f32[128,128], index: 0, kind: input, shape index: {}]   ;;  %s1890_s1 = inlined_call_operand.hbm [shape: f32[512,128], index: 1, kind: input, shape index: {}]   ;;  %s1891_s2 = inlined_call_operand.hbm [shape: f32[256,128], index: 2, kind: input, shape index: {}]   ;;  %s1892_s3 = inlined_call_operand.vmem [shape: f32[128,128], index: 3, kind: output, shape index: {}]  }
   0x1   :  { %10 = vsyncpa [#allocation4 + $0x1], 0 }
   0x2   :  { %11 = vsyncpa [#allocation6], 0 }
   0x3   :  { %13 = vsyncpa [#allocation6 + $0x1], 0  ;;  %s1505_s12 = smov 0   ;;  %s1507_s13 = smov 0  }
   0x4   :  { %s1509_s14 = smov 0   ;;  %s1511_s15 = smov 0  }
   0x5   :  { %s1513_s16 = smov 0   ;;  %s1515_s17 = smov 0  }
   0x6 LB: > { %s985_s18 = sadd.s32 4294967295, %s1479_s17   ;;  %s28_s19 = sadd.s32 1, %s1475_s16  ;;  %s1479_s17 = sphi %s1515_s17, %s19_s17   ;;  %s1475_s16 = sphi %s1513_s16, %s1903_s16   ;;  %s1471_s15 = sphi %s1511_s15, %s1902_s15   ;;  %s1467_s14 = sphi %s1509_s14, %s1901_s14   ;;  %s1463_s13 = sphi %s1507_s13, %s1900_s13   ;;  %s1459_s12 = sphi %s1505_s12, %s1899_s12  }
   0x7   : > { %p29_p0 = scmp.ge.s32.totalorder %s28_s19, 2  ;;  %s64_s20 = sadd.s32 1, %s1467_s14 }
   0x8   : > { %p71_p1 = scmp.ne.s32.totalorder %s1467_s14, %s1463_s13  ;;  %p72_p2 = scmp.eq.s32.totalorder %s1479_s17, 0 }
   0x9   : > { %s1905_s19 = smov (%p29_p0, %s28_s19), 0  ;;  %p77_p4 = scmp.ne.s32.totalorder %s1463_s13, %s1459_s12 }
   0xa   : > { %p1541_p3 = por %p72_p2, %p71_p1  ;;  %s61_s22 = ssub.s32 %s1475_s16, %s1905_s19 }
   0xb   : > { %p78_p5 = scmp.eq.s32.totalorder %s985_s18, 0  ;;  %p62_p6 = scmp.eq.s32.totalorder %s61_s22, 0 }
   0xc   : > { %p1250_p8 = scmp.lt.s32.totalorder %s1479_s17, 2  ;;  %s1557_s25 = sand.u32 1, %s1467_s14  }
   0xd   : > { %p1548_p7 = por %p78_p5, %p77_p4  ;;  %s1021_s26 = sshll.u32 %s1475_s16, 12 }
   0xe   : > { %s1554_s24 = scalar_select %p62_p6, %s1467_s14, %s64_s20  }
   0xf   : > { %s1895_s23 = scalar_select %p1548_p7, 1, 0 }
  0x10   : > { %s989_s27 = sshll.u32 %s1557_s25, 8  ;;  %s1564_s30 = scalar_lea.hbm %s1890_s1, %s1021_s26 }
  0x11   : > { %s166_s4 = scalar_lea.vmem [#allocation3], %s989_s27  ;;  %p1568_p9 = pnand %p1250_p8, %p1541_p3 }
  0x12   : > { %s173_s5 = sshll.u32 %s166_s4, 4  ;;  %s163_s7 = scalar_lea.sflag [#allocation4], %s1557_s25  ;;  %s1572_s5 = int_to_ptr.vmem [resolvable:$true] %s173_s5 }
  0x13   : > { %s1365_s8 = scalar_lea.hbm %s1564_s30, 4096  ;;  %p1367_p11 = pneg %p1568_p9 }
  0x14   : > { %p1366_p10 = scmp.ne.s32.totalorder %s1564_s30, %s1365_s8  ;;  %s1370_s11 = scalar_lea.hbm %s1890_s1, 8192 }
  0x15   : > { %p1371_p0 = scmp.lt.u32.totalorder %s1564_s30, %s1890_s1  ;;  %p1372_p1 = scmp.lt.u32.totalorder %s1370_s11, %s1365_s8 }
  0x16   : > { %p1368_p12 = pnand %p1367_p11, %p1366_p10  ;;  %p1374_p3 = scmp.lt.u32.totalorder %s1365_s8, %s1564_s30 }
  0x17   : > { %p1373_p2 = por %p1372_p1, %p1371_p0 }
  0x18   : > { %p1369_p13 = pneg %p1368_p12 }
  0x19   : > { %p1375_p4 = por %p1374_p3, %p1373_p2 }
  0x1b   : > { %p1376_p5 = pnand %p1375_p4, %p1369_p13 }
  0x1d   : > { %1379 = shalt.err (!%p1376_p5)
}
  0x1e   : > { %s1380_s20 = scalar_lea.vmem %s1572_s5, 4096  ;;  %s1481_s21 = smov [#allocation3]  }
  0x1f   : > { %p1381_p6 = scmp.ne.s32.totalorder %s1572_s5, %s1380_s20  ;;  %s1385_s22 = sshll.u32 %s1481_s21, 4  ;;  %s1386_s22 = int_to_ptr.vmem [resolvable:$false] %s1385_s22 }
  0x20   : > { %s1387_s26 = scalar_lea.vmem %s1386_s22, 8192  ;;  %p1388_p12 = scmp.lt.s32.totalorder %s1572_s5, %s1386_s22 }
  0x21   : > { %p1383_p8 = pnand %p1381_p6, %p1367_p11  ;;  %p1389_p0 = scmp.lt.s32.totalorder %s1387_s26, %s1380_s20 }
  0x23   : > { %p1384_p10 = pneg %p1383_p8  ;;  %p1390_p1 = por %p1389_p0, %p1388_p12 }
  0x25   : > { %p1391_p2 = pnand %p1390_p1, %p1384_p10 }
  0x27   : > { %1394 = shalt.err (!%p1391_p2)
}
  0x28   : > { %s1482_s27 = smov 128   ;;  %s1483_s28 = smov 8  }
  0x29   : > { %1246 = dma.hbm_to_vmem [thread:$0]  (!%p1568_p9), %s1564_s30, 4096, %s1572_s5, %s163_s7, %s1482_s27, %s1482_s27, %s1483_s28  }
  0x2a   : > { %p995_p13 = scmp.ge.s32.totalorder %s1479_s17, 1  ;;  %p202_p3 = scmp.lt.s32.totalorder %s1479_s17, 3 }
  0x2b   : > { %s992_s29 = sshll.u32 %s1557_s25, 7  ;;  %s1022_s8 = sshll.u32 %s1475_s16, 11 }
  0x2c   : > { %p1608_p4 = pnand %p995_p13, %p202_p3  ;;  %s187_s9 = scalar_lea.vmem [#allocation5], %s992_s29 }
  0x2d   : > { %s194_s10 = sshll.u32 %s187_s9, 4  ;;  %s1616_s18 = scalar_lea.hbm %s1891_s2, %s1022_s8  ;;  %s1618_s10 = int_to_ptr.vmem [resolvable:$true] %s194_s10 }
  0x2e   : > { %s184_s30 = scalar_lea.sflag [#allocation6], %s1557_s25  ;;  %s1395_s5 = scalar_lea.hbm %s1616_s18, 2048 }
  0x2f   : > { %p1396_p5 = scmp.ne.s32.totalorder %s1616_s18, %s1395_s5  ;;  %s1400_s21 = scalar_lea.hbm %s1891_s2, 4096 }
  0x30   : > { %p1401_p10 = scmp.lt.u32.totalorder %s1616_s18, %s1891_s2  ;;  %p1402_p12 = scmp.lt.u32.totalorder %s1400_s21, %s1395_s5 }
  0x31   : > { %p1398_p6 = pnand %p1396_p5, %p1367_p11  ;;  %p1404_p1 = scmp.lt.u32.totalorder %s1395_s5, %s1616_s18 }
  0x32   : > { %p1403_p0 = por %p1402_p12, %p1401_p10 }
  0x33   : > { %p1399_p8 = pneg %p1398_p6 }
  0x34   : > { %p1405_p2 = por %p1404_p1, %p1403_p0 }
  0x36   : > { %p1406_p13 = pnand %p1405_p2, %p1399_p8 }
  0x38   : > { %1409 = shalt.err (!%p1406_p13)
}
  0x39   : > { %s1410_s29 = scalar_lea.vmem %s1618_s10, 2048  ;;  %s1484_s8 = smov [#allocation5]  }
  0x3a   : > { %p1411_p3 = scmp.ne.s32.totalorder %s1618_s10, %s1410_s29  ;;  %s1415_s9 = sshll.u32 %s1484_s8, 4  ;;  %s1416_s9 = int_to_ptr.vmem [resolvable:$false] %s1415_s9 }
  0x3b   : > { %s1417_s11 = scalar_lea.vmem %s1416_s9, 4096  ;;  %p1418_p7 = scmp.lt.s32.totalorder %s1618_s10, %s1416_s9 }
  0x3c   : > { %p1413_p5 = pnand %p1411_p3, %p1367_p11  ;;  %p1419_p10 = scmp.lt.s32.totalorder %s1417_s11, %s1410_s29 }
  0x3e   : > { %p1414_p6 = pneg %p1413_p5  ;;  %p1420_p12 = por %p1419_p10, %p1418_p7 }
  0x40   : > { %p1421_p0 = pnand %p1420_p12, %p1414_p6 }
  0x42   : > { %1424 = shalt.err (!%p1421_p0)
}
  0x43   : > { %1249 = dma.hbm_to_vmem [thread:$0]  (!%p1568_p9), %s1616_s18, 2048, %s1618_s10, %s184_s30, %s1482_s27, %s1482_s27, %s1483_s28  }
  0x44   : > { %206 = sbr.rel (%p1608_p4) target bundleno = 685 (0x2ad), region = 32  ;;  %s208_s12 = sand.u32 (!%p1608_p4), 1, %s1463_s13  }
  0x45   : > { %s996_s5 = sshll.u32 (!%p1608_p4), %s208_s12, 8  ;;  %s209_s7 = scalar_lea.sflag (!%p1608_p4), [#allocation4], %s208_s12 }
  0x46   : > { %s1652_s20 = scalar_lea.vmem (!%p1608_p4), [#allocation3], %s996_s5  ;;  %p1898_p7 = scmp.ne.s32.totalorder (!%p1608_p4), %s1895_s23, 0 }
  0x4b   : > { %1450 = dma.done.wait (%p1898_p7), %s209_s7, 4096  }
  0x4c   : > { %1452 = vsyncadd (%p1898_p7), %s209_s7, 4294963200  ;;  %s997_s25 = sshll.u32 %s208_s12, 7  ;;  %s218_s6 = scalar_lea.sflag [#allocation6], %s208_s12 }
  0x4d   : > { %s1658_s21 = scalar_lea.vmem [#allocation5], %s997_s25 }
  0x4e   : > { %1454 = dma.done.wait (%p1898_p7), %s218_s6, 2048  }
  0x4f   : > { %1456 = vsyncadd (%p1898_p7), %s218_s6, 4294965248  ;;  %v300_v0 = vld [vmem:[%s1652_s20 + $0x80] sm:$0xff]  ;;  %v301_v1 = vld [vmem:[%s1652_s20 + $0x88] sm:$0xff]  ;;  %p1014_p9 = scmp.ne.s32.totalorder %s1471_s15, 0 }
  0x50   : > { %v284_v2 = vld [vmem:[%s1652_s20] sm:$0xff]  ;;  %v1175_v3 = vpack.c.bf16 %v301_v1, %v300_v0  ;;  %v285_v4 = vld [vmem:[%s1652_s20 + $0x8] sm:$0xff]  ;;  %v302_v5 = vld [vmem:[%s1652_s20 + $0x90] sm:$0xff] }
  0x51   : > { %v303_v6 = vld [vmem:[%s1652_s20 + $0x98] sm:$0xff]  ;;  %v1177_v7 = vpack.c.bf16 %v285_v4, %v284_v2  ;;  %v286_v9 = vld [vmem:[%s1652_s20 + $0x10] sm:$0xff]  ;;  %v304_v11 = vld [vmem:[%s1652_s20 + $0xa0] sm:$0xff] }
  0x52   : > { %v1179_v8 = vpack.c.bf16 %v303_v6, %v302_v5  ;;  %1176 = vmatprep.subr.bf16.mxu0 %v1175_v3  ;;  %v287_v10 = vld [vmem:[%s1652_s20 + $0x18] sm:$0xff]  ;;  %v305_v12 = vld [vmem:[%s1652_s20 + $0xa8] sm:$0xff]  ;;  %v268_v15 = vld [vmem:[%s1889_s0] sm:$0xff] }
  0x53   : > { %1178 = vmatpush3.bf16.xpose.msra.mxu0 %v1177_v7  ;;  %v1181_v13 = vpack.c.bf16 %v287_v10, %v286_v9  ;;  %v1183_v14 = vpack.c.bf16 %v305_v12, %v304_v11  ;;  %1055 = vmatprep.mubr.f32.mxu0 %v268_v15  ;;  %v288_v16 = vld [vmem:[%s1652_s20 + $0x20] sm:$0xff]  ;;  %v289_v17 = vld [vmem:[%s1652_s20 + $0x28] sm:$0xff]  ;;  %v306_v18 = vld [vmem:[%s1652_s20 + $0xb0] sm:$0xff] }
  0x54   : > { %1180 = vmatprep.subr.bf16.mxu0 %v1179_v8  ;;  %v307_v19 = vld [vmem:[%s1652_s20 + $0xb8] sm:$0xff]  ;;  %v1185_v20 = vpack.c.bf16 %v289_v17, %v288_v16  ;;  %v290_v22 = vld [vmem:[%s1652_s20 + $0x30] sm:$0xff]  ;;  %v308_v24 = vld [vmem:[%s1652_s20 + $0xc0] sm:$0xff] }
  0x55   : > { %v1187_v21 = vpack.c.bf16 %v307_v19, %v306_v18  ;;  %v291_v23 = vld [vmem:[%s1652_s20 + $0x38] sm:$0xff]  ;;  %v309_v25 = vld [vmem:[%s1652_s20 + $0xc8] sm:$0xff]  ;;  %v292_v28 = vld [vmem:[%s1652_s20 + $0x40] sm:$0xff] }
  0x56   : > { %v1189_v26 = vpack.c.bf16 %v291_v23, %v290_v22  ;;  %v1191_v27 = vpack.c.bf16 %v309_v25, %v308_v24  ;;  %v293_v29 = vld [vmem:[%s1652_s20 + $0x48] sm:$0xff]  ;;  %v310_v30 = vld [vmem:[%s1652_s20 + $0xd0] sm:$0xff]  ;;  %v311_v31 = vld [vmem:[%s1652_s20 + $0xd8] sm:$0xff] }
  0x57   : > { %v1193_v32 = vpack.c.bf16 %v293_v29, %v292_v28  ;;  %v1195_v33 = vpack.c.bf16 %v311_v31, %v310_v30  ;;  %v294_v34 = vld [vmem:[%s1652_s20 + $0x50] sm:$0xff]  ;;  %v295_v35 = vld [vmem:[%s1652_s20 + $0x58] sm:$0xff]  ;;  %v312_v36 = vld [vmem:[%s1652_s20 + $0xe0] sm:$0xff] }
  0x58   : > { %v313_v37 = vld [vmem:[%s1652_s20 + $0xe8] sm:$0xff]  ;;  %v1197_v38 = vpack.c.bf16 %v295_v35, %v294_v34  ;;  %v296_v40 = vld [vmem:[%s1652_s20 + $0x60] sm:$0xff]  ;;  %v314_v42 = vld [vmem:[%s1652_s20 + $0xf0] sm:$0xff] }
  0x59   : > { %v1199_v39 = vpack.c.bf16 %v313_v37, %v312_v36  ;;  %v297_v41 = vld [vmem:[%s1652_s20 + $0x68] sm:$0xff]  ;;  %v315_v43 = vld [vmem:[%s1652_s20 + $0xf8] sm:$0xff]  ;;  %v298_v46 = vld [vmem:[%s1652_s20 + $0x70] sm:$0xff] }
  0x5a   : > { %v1201_v44 = vpack.c.bf16 %v297_v41, %v296_v40  ;;  %v1203_v45 = vpack.c.bf16 %v315_v43, %v314_v42  ;;  %v299_v47 = vld [vmem:[%s1652_s20 + $0x78] sm:$0xff]  ;;  %v269_v49 = vld [vmem:[%s1889_s0 + $0x8] sm:$0xff]  ;;  %v270_v50 = vld [vmem:[%s1889_s0 + $0x10] sm:$0xff] }
  0x5b   : > { %1182 = vmatpush3.bf16.xpose.msra.mxu0 %v1181_v13  ;;  %v1205_v48 = vpack.c.bf16 %v299_v47, %v298_v46  ;;  %v271_v51 = vld [vmem:[%s1889_s0 + $0x18] sm:$0xff]  ;;  %v272_v52 = vld [vmem:[%s1889_s0 + $0x20] sm:$0xff]  ;;  %v273_v53 = vld [vmem:[%s1889_s0 + $0x28] sm:$0xff] }
  0x5c   : > { %1184 = vmatprep.subr.bf16.mxu0 %v1183_v14  ;;  %v274_v54 = vld [vmem:[%s1889_s0 + $0x30] sm:$0xff]  ;;  %v275_v55 = vld [vmem:[%s1889_s0 + $0x38] sm:$0xff]  ;;  %v276_v56 = vld [vmem:[%s1889_s0 + $0x40] sm:$0xff] }
  0x5d   : > { %v277_v57 = vld [vmem:[%s1889_s0 + $0x48] sm:$0xff]  ;;  %v278_v58 = vld [vmem:[%s1889_s0 + $0x50] sm:$0xff]  ;;  %v279_v59 = vld [vmem:[%s1889_s0 + $0x58] sm:$0xff] }
  0x5e   : > { %v280_v60 = vld [vmem:[%s1889_s0 + $0x60] sm:$0xff]  ;;  %v281_v61 = vld [vmem:[%s1889_s0 + $0x68] sm:$0xff]  ;;  %v282_v62 = vld [vmem:[%s1889_s0 + $0x70] sm:$0xff] }
  0x5f   : > { %v283_v63 = vld [vmem:[%s1889_s0 + $0x78] sm:$0xff]  ;;  %v605_v0 = vld [vmem:[%s1658_s21] sm:$0xff]  ;;  %v606_v1 = vld [vmem:[%s1658_s21 + $0x8] sm:$0xff] }
  0x60   : > { %v1207_v2 = vpack.c.bf16 %v606_v1, %v605_v0  ;;  %v607_v3 = vld [vmem:[%s1658_s21 + $0x10] sm:$0xff]  ;;  %v608_v4 = vld [vmem:[%s1658_s21 + $0x18] sm:$0xff]  ;;  %v609_v6 = vld [vmem:[%s1658_s21 + $0x20] sm:$0xff] }
  0x61   : > { %v1211_v5 = vpack.c.bf16 %v608_v4, %v607_v3  ;;  %v610_v7 = vld [vmem:[%s1658_s21 + $0x28] sm:$0xff]  ;;  %v611_v9 = vld [vmem:[%s1658_s21 + $0x30] sm:$0xff]  ;;  %v612_v10 = vld [vmem:[%s1658_s21 + $0x38] sm:$0xff] }
  0x62   : > { %1208 = vmatprep.subr.bf16.mxu1 %v1207_v2  ;;  %v1215_v8 = vpack.c.bf16 %v610_v7, %v609_v6  ;;  %v1219_v11 = vpack.c.bf16 %v612_v10, %v611_v9  ;;  %v613_v12 = vld [vmem:[%s1658_s21 + $0x40] sm:$0xff]  ;;  %v614_v13 = vld [vmem:[%s1658_s21 + $0x48] sm:$0xff]  ;;  %v616_v16 = vld [vmem:[%s1658_s21 + $0x58] sm:$0xff] }
  0x63   : > { %1186 = vmatpush3.bf16.xpose.msra.mxu0 %v1185_v20  ;;  %1210 = vmatpush3.bf16.msra.mxu1 %v1207_v2  ;;  %v1223_v14 = vpack.c.bf16 %v614_v13, %v613_v12  ;;  %v617_v18 = vld [vmem:[%s1658_s21 + $0x60] sm:$0xff]  ;;  %v618_v19 = vld [vmem:[%s1658_s21 + $0x68] sm:$0xff]  ;;  %v620_v22 = vld [vmem:[%s1658_s21 + $0x78] sm:$0xff] }
  0x64   : > { %1188 = vmatprep.subr.bf16.mxu0 %v1187_v21  ;;  %1212 = vmatprep.subr.bf16.mxu1 %v1211_v5  ;;  %v1231_v20 = vpack.c.bf16 %v618_v19, %v617_v18  ;;  %v619_v21 = vld [vmem:[%s1658_s21 + $0x70] sm:$0xff] }
  0x65   : > { %v1235_v23 = vpack.c.bf16 %v620_v22, %v619_v21 }
  0x67   : > { %1214 = vmatpush3.bf16.msra.mxu1 %v1211_v5 }
  0x68   : > { %1216 = vmatprep.subr.bf16.mxu1 %v1215_v8 }
  0x6b   : > { %1190 = vmatpush3.bf16.xpose.msra.mxu0 %v1189_v26  ;;  %1218 = vmatpush3.bf16.msra.mxu1 %v1215_v8 }
  0x6c   : > { %1192 = vmatprep.subr.bf16.mxu0 %v1191_v27  ;;  %1220 = vmatprep.subr.bf16.mxu1 %v1219_v11 }
  0x6f   : > { %1222 = vmatpush3.bf16.msra.mxu1 %v1219_v11 }
  0x70   : > { %1224 = vmatprep.subr.bf16.mxu1 %v1223_v14 }
  0x73   : > { %1194 = vmatpush3.bf16.xpose.msra.mxu0 %v1193_v32  ;;  %1226 = vmatpush3.bf16.msra.mxu1 %v1223_v14 }
  0x74   : > { %1196 = vmatprep.subr.bf16.mxu0 %v1195_v33 }
  0x7b   : > { %1198 = vmatpush3.bf16.xpose.msra.mxu0 %v1197_v38 }
  0x7c   : > { %1200 = vmatprep.subr.bf16.mxu0 %v1199_v39 }
  0x83   : > { %1202 = vmatpush3.bf16.xpose.msra.mxu0 %v1201_v44 }
  0x84   : > { %1204 = vmatprep.subr.bf16.mxu0 %v1203_v45 }
  0x8b   : > { %1206 = vmatpush3.bf16.xpose.msra.mxu0 %v1205_v48 }
  0x92   : > { %1056 = vmatmul.mubr.f32.vlgmr.msra.gmra.mrb[0].mxu0 %v268_v15  ;;  %v615_v15 = vld [vmem:[%s1658_s21 + $0x50] sm:$0xff] }
  0x93   : > { %1057 = vmatprep.mubr.f32.mxu0 %v269_v49  ;;  %v1227_v17 = vpack.c.bf16 %v616_v16, %v615_v15 }
  0x95   : > { %1228 = vmatprep.subr.bf16.mxu1 %v1227_v17 }
  0x96   : > { %1058 = vmatmul.mubr.f32.gmra.mrb[2].mxu0 %v269_v49  ;;  %1230 = vmatpush3.bf16.msra.mxu1 %v1227_v17 }
  0x97   : > { %1059 = vmatprep.mubr.f32.mxu0 %v270_v50  ;;  %1232 = vmatprep.subr.bf16.mxu1 %v1231_v20 }
  0x9a   : > { %1060 = vmatmul.mubr.f32.gmra.mrb[4].mxu0 %v270_v50  ;;  %1234 = vmatpush3.bf16.msra.mxu1 %v1231_v20 }
  0x9b   : > { %1061 = vmatprep.mubr.f32.mxu0 %v271_v51  ;;  %1236 = vmatprep.subr.bf16.mxu1 %v1235_v23 }
  0x9e   : > { %1062 = vmatmul.mubr.f32.gmra.mrb[6].mxu0 %v271_v51  ;;  %1238 = vmatpush3.bf16.msra.mxu1 %v1235_v23 }
  0x9f   : > { %1063 = vmatprep.mubr.f32.mxu0 %v272_v52 }
  0xa2   : > { %1064 = vmatmul.mubr.f32.gmra.mrb[8].mxu0 %v272_v52 }
  0xa3   : > { %1065 = vmatprep.mubr.f32.mxu0 %v273_v53 }
  0xa6   : > { %1066 = vmatmul.mubr.f32.gmra.mrb[10].mxu0 %v273_v53 }
  0xa7   : > { %1067 = vmatprep.mubr.f32.mxu0 %v274_v54 }
  0xaa   : > { %1068 = vmatmul.mubr.f32.gmra.mrb[12].mxu0 %v274_v54 }
  0xab   : > { %1069 = vmatprep.mubr.f32.mxu0 %v275_v55 }
  0xae   : > { %1070 = vmatmul.mubr.f32.gmra.mrb[14].mxu0 %v275_v55 }
  0xaf   : > { %1071 = vmatprep.mubr.f32.mxu0 %v276_v56 }
  0xb2   : > { %1072 = vmatmul.mubr.f32.gmra.mrb[16].mxu0 %v276_v56 }
  0xb3   : > { %1073 = vmatprep.mubr.f32.mxu0 %v277_v57 }
  0xb6   : > { %1074 = vmatmul.mubr.f32.gmra.mrb[18].mxu0 %v277_v57 }
  0xb7   : > { %1075 = vmatprep.mubr.f32.mxu0 %v278_v58 }
  0xba   : > { %1076 = vmatmul.mubr.f32.gmra.mrb[20].mxu0 %v278_v58 }
  0xbb   : > { %1077 = vmatprep.mubr.f32.mxu0 %v279_v59 }
  0xbe   : > { %1078 = vmatmul.mubr.f32.gmra.mrb[22].mxu0 %v279_v59 }
  0xbf   : > { %1079 = vmatprep.mubr.f32.mxu0 %v280_v60 }
  0xc2   : > { %1080 = vmatmul.mubr.f32.gmra.mrb[24].mxu0 %v280_v60 }
  0xc3   : > { %1081 = vmatprep.mubr.f32.mxu0 %v281_v61 }
  0xc6   : > { %1082 = vmatmul.mubr.f32.gmra.mrb[26].mxu0 %v281_v61 }
  0xc7   : > { %1083 = vmatprep.mubr.f32.mxu0 %v282_v62 }
  0xca   : > { %1084 = vmatmul.mubr.f32.gmra.mrb[28].mxu0 %v282_v62 }
  0xcb   : > { %1085 = vmatprep.mubr.f32.mxu0 %v283_v63 }
  0xce   : > { %1086 = vmatmul.mubr.f32.gmra.mrb[30].mxu0 %v283_v63 }
 0x165   : > { %v382_v24 = vpop.f32.mrb[0].mxu0 }
 0x166   : > { %v998_v25 = vmul.f32 -1.442695, %v382_v24  ;;  %v384_v26 = vpop.f32.mrb[1].mxu0 }
 0x168   : > { %1301 = vpow2.f32 %v998_v25 }
 0x169   : > { %v388_v27 = vpop.f32.mrb[2].mxu0 }
 0x16a   : > { %v999_v28 = vmul.f32 -1.442695, %v388_v27  ;;  %v390_v29 = vpop.f32.mrb[3].mxu0 }
 0x16c   : > { %1303 = vpow2.f32 %v999_v28 }
 0x16d   : > { %v394_v30 = vpop.f32.mrb[4].mxu0 }
 0x16e   : > { %v1000_v31 = vmul.f32 -1.442695, %v394_v30  ;;  %v396_v32 = vpop.f32.mrb[5].mxu0 }
 0x170   : > { %1305 = vpow2.f32 %v1000_v31 }
 0x171   : > { %v400_v33 = vpop.f32.mrb[6].mxu0 }
 0x172   : > { %v1302_v34 = vpop.eup %1301  ;;  %v1001_v35 = vmul.f32 -1.442695, %v400_v33  ;;  %v402_v36 = vpop.f32.mrb[7].mxu0 }
 0x173   : > { %v525_v37 = vadd.f32 1.0, %v1302_v34 }
 0x174   : > { %1307 = vpow2.f32 %v1001_v35 }
 0x175   : > { %1309 = vrcp.f32 %v525_v37  ;;  %v1760_v38 = vpop.f32.mrb[8].mxu0 }
 0x176   : > { %v1304_v39 = vpop.eup %1303  ;;  %v1002_v40 = vmul.f32 -1.442695, %v1760_v38  ;;  %v1763_v41 = vpop.f32.mrb[9].mxu0 }
 0x177   : > { %v526_v42 = vadd.f32 1.0, %v1304_v39 }
 0x178   : > { %1311 = vpow2.f32 %v1002_v40 }
 0x179   : > { %1313 = vrcp.f32 %v526_v42  ;;  %v1765_v43 = vpop.f32.mrb[10].mxu0 }
 0x17a   : > { %v1306_v44 = vpop.eup %1305  ;;  %v1003_v45 = vmul.f32 -1.442695, %v1765_v43  ;;  %v1768_v46 = vpop.f32.mrb[11].mxu0 }
 0x17b   : > { %v527_v47 = vadd.f32 1.0, %v1306_v44 }
 0x17c   : > { %1315 = vpow2.f32 %v1003_v45 }
 0x17d   : > { %1317 = vrcp.f32 %v527_v47  ;;  %v1770_v48 = vpop.f32.mrb[12].mxu0 }
 0x17e   : > { %v1308_v49 = vpop.eup %1307  ;;  %v1004_v50 = vmul.f32 -1.442695, %v1770_v48  ;;  %v1773_v51 = vpop.f32.mrb[13].mxu0 }
 0x17f   : > { %v1310_v52 = vpop.eup %1309  ;;  %v528_v53 = vadd.f32 1.0, %v1308_v49 }
 0x180   : > { %v573_v54 = vmul.f32 %v1310_v52, %v382_v24  ;;  %1319 = vpow2.f32 %v1004_v50 }
 0x181   : > { %1321 = vrcp.f32 %v528_v53  ;;  %v1775_v55 = vpop.f32.mrb[14].mxu0 }
 0x182   : > { %v1312_v56 = vpop.eup %1311  ;;  %v1005_v57 = vmul.f32 -1.442695, %v1775_v55  ;;  %v1778_v58 = vpop.f32.mrb[15].mxu0  ;;  %v589_v59 = vmul.f32 %v573_v54, %v384_v26 }
 0x183   : > { %v1314_v60 = vpop.eup %1313  ;;  %v529_v61 = vadd.f32 1.0, %v1312_v56 }
 0x184   : > { %v574_v62 = vmul.f32 %v1314_v60, %v388_v27  ;;  %1323 = vpow2.f32 %v1005_v57  ;;  %1151 = vmatprep.mubr.f32.mxu1 %v589_v59 }
 0x185   : > { %1325 = vrcp.f32 %v529_v61  ;;  %v1780_v63 = vpop.f32.mrb[16].mxu0 }
 0x186   : > { %v1316_v0 = vpop.eup %1315  ;;  %v590_v1 = vmul.f32 %v574_v62, %v390_v29  ;;  %v1006_v2 = vmul.f32 -1.442695, %v1780_v63  ;;  %v1783_v3 = vpop.f32.mrb[17].mxu0 }
 0x187   : > { %v1318_v4 = vpop.eup %1317  ;;  %v530_v5 = vadd.f32 1.0, %v1316_v0 }
 0x188   : > { %v575_v6 = vmul.f32 %v1318_v4, %v394_v30  ;;  %1327 = vpow2.f32 %v1006_v2  ;;  %1152 = vmatmul.mubr.f32.vlgmr.msra.gmra.mrb[0].mxu1 %v590_v1 }
 0x189   : > { %1329 = vrcp.f32 %v530_v5  ;;  %v1785_v7 = vpop.f32.mrb[18].mxu0 }
 0x18a   : > { %v1320_v8 = vpop.eup %1319  ;;  %v591_v9 = vmul.f32 %v575_v6, %v396_v32  ;;  %v1007_v10 = vmul.f32 -1.442695, %v1785_v7  ;;  %v1788_v11 = vpop.f32.mrb[19].mxu0 }
 0x18b   : > { %v1322_v12 = vpop.eup %1321  ;;  %v531_v13 = vadd.f32 1.0, %v1320_v8 }
 0x18c   : > { %v576_v14 = vmul.f32 %v1322_v12, %v400_v33  ;;  %1331 = vpow2.f32 %v1007_v10  ;;  %1154 = vmatprep.mubr.f32.mxu1 %v591_v9 }
 0x18d   : > { %1333 = vrcp.f32 %v531_v13  ;;  %v1790_v15 = vpop.f32.mrb[20].mxu0 }
 0x18e   : > { %v1324_v16 = vpop.eup %1323  ;;  %v592_v17 = vmul.f32 %v576_v14, %v402_v36  ;;  %v1008_v18 = vmul.f32 -1.442695, %v1790_v15  ;;  %v1793_v19 = vpop.f32.mrb[21].mxu0 }
 0x18f   : > { %v1326_v20 = vpop.eup %1325  ;;  %v532_v21 = vadd.f32 1.0, %v1324_v16 }
 0x190   : > { %v577_v22 = vmul.f32 %v1326_v20, %v1760_v38  ;;  %1335 = vpow2.f32 %v1008_v18  ;;  %1155 = vmatmul.mubr.f32.gmra.mrb[2].mxu1 %v592_v17 }
 0x191   : > { %1337 = vrcp.f32 %v532_v21  ;;  %v1796_v23 = vpop.f32.mrb[22].mxu0 }
 0x192   : > { %v1328_v24 = vpop.eup %1327  ;;  %v593_v25 = vmul.f32 %v577_v22, %v1763_v41  ;;  %v1009_v26 = vmul.f32 -1.442695, %v1796_v23  ;;  %v1800_v27 = vpop.f32.mrb[23].mxu0 }
 0x193   : > { %v1330_v28 = vpop.eup %1329  ;;  %v533_v29 = vadd.f32 1.0, %v1328_v24 }
 0x194   : > { %v578_v30 = vmul.f32 %v1330_v28, %v1765_v43  ;;  %1339 = vpow2.f32 %v1009_v26  ;;  %1157 = vmatprep.mubr.f32.mxu1 %v593_v25 }
 0x195   : > { %1341 = vrcp.f32 %v533_v29  ;;  %v454_v31 = vpop.f32.mrb[24].mxu0 }
 0x196   : > { %v1332_v32 = vpop.eup %1331  ;;  %v594_v33 = vmul.f32 %v578_v30, %v1768_v46  ;;  %v1010_v34 = vmul.f32 -1.442695, %v454_v31  ;;  %v456_v35 = vpop.f32.mrb[25].mxu0 }
 0x197   : > { %v1334_v36 = vpop.eup %1333  ;;  %v534_v37 = vadd.f32 1.0, %v1332_v32 }
 0x198   : > { %v579_v38 = vmul.f32 %v1334_v36, %v1770_v48  ;;  %1343 = vpow2.f32 %v1010_v34  ;;  %1158 = vmatmul.mubr.f32.gmra.mrb[4].mxu1 %v594_v33 }
 0x199   : > { %1345 = vrcp.f32 %v534_v37  ;;  %v460_v39 = vpop.f32.mrb[26].mxu0 }
 0x19a   : > { %v1336_v40 = vpop.eup %1335  ;;  %v595_v41 = vmul.f32 %v579_v38, %v1773_v51  ;;  %v1011_v42 = vmul.f32 -1.442695, %v460_v39  ;;  %v462_v43 = vpop.f32.mrb[27].mxu0 }
 0x19b   : > { %v1338_v44 = vpop.eup %1337  ;;  %v535_v45 = vadd.f32 1.0, %v1336_v40 }
 0x19c   : > { %v580_v47 = vmul.f32 %v1338_v44, %v1775_v55  ;;  %1347 = vpow2.f32 %v1011_v42  ;;  %1160 = vmatprep.mubr.f32.mxu1 %v595_v41 }
 0x19d   : > { %1349 = vrcp.f32 %v535_v45  ;;  %v466_v46 = vpop.f32.mrb[28].mxu0 }
 0x19e   : > { %v1340_v49 = vpop.eup %1339  ;;  %v596_v48 = vmul.f32 %v580_v47, %v1778_v58  ;;  %v1012_v50 = vmul.f32 -1.442695, %v466_v46  ;;  %v468_v52 = vpop.f32.mrb[29].mxu0 }
 0x19f   : > { %v1342_v53 = vpop.eup %1341  ;;  %v536_v54 = vadd.f32 1.0, %v1340_v49 }
 0x1a0   : > { %v581_v56 = vmul.f32 %v1342_v53, %v1780_v63  ;;  %1351 = vpow2.f32 %v1012_v50  ;;  %1161 = vmatmul.mubr.f32.gmra.mrb[6].mxu1 %v596_v48 }
 0x1a1   : > { %1353 = vrcp.f32 %v536_v54  ;;  %v472_v51 = vpop.f32.mrb[30].mxu0 }
 0x1a2   : > { %v1344_v57 = vpop.eup %1343  ;;  %v597_v55 = vmul.f32 %v581_v56, %v1783_v3  ;;  %v1013_v59 = vmul.f32 -1.442695, %v472_v51  ;;  %v474_v60 = vpop.f32.mrb[31].mxu0 }
 0x1a3   : > { %v1346_v61 = vpop.eup %1345  ;;  %v537_v62 = vadd.f32 1.0, %v1344_v57 }
 0x1a4   : > { %v582_v0 = vmul.f32 %v1346_v61, %v1785_v7  ;;  %1355 = vpow2.f32 %v1013_v59  ;;  %1163 = vmatprep.mubr.f32.mxu1 %v597_v55 }
 0x1a5   : > { %1357 = vrcp.f32 %v537_v62 }
 0x1a6   : > { %v1348_v58 = vpop.eup %1347  ;;  %v598_v1 = vmul.f32 %v582_v0, %v1788_v11 }
 0x1a7   : > { %v1350_v63 = vpop.eup %1349  ;;  %v538_v2 = vadd.f32 1.0, %v1348_v58 }
 0x1a8   : > { %v583_v4 = vmul.f32 %v1350_v63, %v1790_v15  ;;  %1164 = vmatmul.mubr.f32.gmra.mrb[8].mxu1 %v598_v1 }
 0x1a9   : > { %1359 = vrcp.f32 %v538_v2 }
 0x1aa   : > { %v1352_v5 = vpop.eup %1351  ;;  %v599_v3 = vmul.f32 %v583_v4, %v1793_v19 }
 0x1ab   : > { %v1354_v6 = vpop.eup %1353  ;;  %v539_v8 = vadd.f32 1.0, %v1352_v5 }
 0x1ac   : > { %v584_v9 = vmul.f32 %v1354_v6, %v1796_v23  ;;  %1166 = vmatprep.mubr.f32.mxu1 %v599_v3 }
 0x1ad   : > { %1361 = vrcp.f32 %v539_v8 }
 0x1ae   : > { %v1356_v7 = vpop.eup %1355  ;;  %v600_v10 = vmul.f32 %v584_v9, %v1800_v27 }
 0x1af   : > { %v1358_v12 = vpop.eup %1357  ;;  %v540_v11 = vadd.f32 1.0, %v1356_v7 }
 0x1b0   : > { %v585_v13 = vmul.f32 %v1358_v12, %v454_v31  ;;  %1167 = vmatmul.mubr.f32.gmra.mrb[10].mxu1 %v600_v10 }
 0x1b1   : > { %1363 = vrcp.f32 %v540_v11 }
 0x1b2   : > { %v601_v14 = vmul.f32 %v585_v13, %v456_v35 }
 0x1b3   : > { %v1360_v15 = vpop.eup %1359 }
 0x1b4   : > { %v586_v16 = vmul.f32 %v1360_v15, %v460_v39  ;;  %1169 = vmatprep.mubr.f32.mxu1 %v601_v14 }
 0x1b6   : > { %v602_v17 = vmul.f32 %v586_v16, %v462_v43 }
 0x1b7   : > { %v1362_v18 = vpop.eup %1361 }
 0x1b8   : > { %v587_v19 = vmul.f32 %v1362_v18, %v466_v46  ;;  %1170 = vmatmul.mubr.f32.gmra.mrb[12].mxu1 %v602_v17 }
 0x1ba   : > { %v603_v20 = vmul.f32 %v587_v19, %v468_v52 }
 0x1bb   : > { %v1364_v21 = vpop.eup %1363 }
 0x1bc   : > { %v588_v22 = vmul.f32 %v1364_v21, %v472_v51  ;;  %1172 = vmatprep.mubr.f32.mxu1 %v603_v20 }
 0x1be   : > { %v604_v23 = vmul.f32 %v588_v22, %v474_v60 }
 0x1c0   : > { %1173 = vmatmul.mubr.f32.gmra.mrb[14].mxu1 %v604_v23 }
 0x25b   : > { %v1153_v24 = vpop.f32.mrb[0].mxu1 }
 0x25c   : > { %v687_v25 = vpop.f32.mrb[1].mxu1  ;;  %771 = vst [vmem:[#allocation2 + $0x8] sm:$0xff] (!%p1014_p9), %v1153_v24 }
 0x25d   : > { %770 = vst [vmem:[#allocation2] sm:$0xff] (!%p1014_p9), %v687_v25 }
 0x263   : > { %v1156_v26 = vpop.f32.mrb[2].mxu1 }
 0x264   : > { %v697_v27 = vpop.f32.mrb[3].mxu1  ;;  %773 = vst [vmem:[#allocation2 + $0x18] sm:$0xff] (!%p1014_p9), %v1156_v26 }
 0x265   : > { %772 = vst [vmem:[#allocation2 + $0x10] sm:$0xff] (!%p1014_p9), %v697_v27 }
 0x26b   : > { %v1159_v28 = vpop.f32.mrb[4].mxu1 }
 0x26c   : > { %v707_v29 = vpop.f32.mrb[5].mxu1  ;;  %775 = vst [vmem:[#allocation2 + $0x28] sm:$0xff] (!%p1014_p9), %v1159_v28 }
 0x26d   : > { %774 = vst [vmem:[#allocation2 + $0x20] sm:$0xff] (!%p1014_p9), %v707_v29 }
 0x273   : > { %v1162_v30 = vpop.f32.mrb[6].mxu1 }
 0x274   : > { %v717_v31 = vpop.f32.mrb[7].mxu1  ;;  %777 = vst [vmem:[#allocation2 + $0x38] sm:$0xff] (!%p1014_p9), %v1162_v30 }
 0x275   : > { %776 = vst [vmem:[#allocation2 + $0x30] sm:$0xff] (!%p1014_p9), %v717_v31 }
 0x27b   : > { %v1165_v32 = vpop.f32.mrb[8].mxu1 }
 0x27c   : > { %v727_v33 = vpop.f32.mrb[9].mxu1  ;;  %779 = vst [vmem:[#allocation2 + $0x48] sm:$0xff] (!%p1014_p9), %v1165_v32 }
 0x27d   : > { %778 = vst [vmem:[#allocation2 + $0x40] sm:$0xff] (!%p1014_p9), %v727_v33 }
 0x283   : > { %v1168_v34 = vpop.f32.mrb[10].mxu1 }
 0x284   : > { %v737_v35 = vpop.f32.mrb[11].mxu1  ;;  %781 = vst [vmem:[#allocation2 + $0x58] sm:$0xff] (!%p1014_p9), %v1168_v34 }
 0x285   : > { %780 = vst [vmem:[#allocation2 + $0x50] sm:$0xff] (!%p1014_p9), %v737_v35 }
 0x28b   : > { %v1171_v36 = vpop.f32.mrb[12].mxu1 }
 0x28c   : > { %v747_v37 = vpop.f32.mrb[13].mxu1  ;;  %783 = vst [vmem:[#allocation2 + $0x68] sm:$0xff] (!%p1014_p9), %v1171_v36 }
 0x28d   : > { %782 = vst [vmem:[#allocation2 + $0x60] sm:$0xff] (!%p1014_p9), %v747_v37 }
 0x28e   : > { %769 = sbr.rel (%p1014_p9) target bundleno = 662 (0x296), region = 44 }
 0x293   : > { %v1816_v38 = vpop.f32.mrb[14].mxu1 }
 0x294   : > { %v757_v39 = vpop.f32.mrb[15].mxu1  ;;  %785 = vst [vmem:[#allocation2 + $0x78] sm:$0xff] (!%p1014_p9), %v1816_v38 }
 0x295   : > { %784 = vst [vmem:[#allocation2 + $0x70] sm:$0xff] %v757_v39 }
 0x296 PF: > { %p1015_p11 = scmp.eq.s32.totalorder %s1471_s15, 0 }
 0x297   : > { %v790_v40 = vld [vmem:[#allocation2] sm:$0xff] (!%p1015_p11)  ;;  %v791_v41 = vld [vmem:[#allocation2 + $0x8] sm:$0xff] (!%p1015_p11)  ;;  %v792_v42 = vld [vmem:[#allocation2 + $0x10] sm:$0xff] (!%p1015_p11) }
 0x298   : > { %789 = sbr.rel (%p1015_p11) target bundleno = 674 (0x2a2), region = 48  ;;  %v806_v43 = vadd.f32 (!%p1015_p11), %v790_v40, %v687_v25  ;;  %v807_v44 = vadd.f32 (!%p1015_p11), %v1153_v24, %v791_v41  ;;  %v808_v45 = vadd.f32 (!%p1015_p11), %v792_v42, %v697_v27  ;;  %v793_v47 = vld [vmem:[#allocation2 + $0x18] sm:$0xff] (!%p1015_p11)  ;;  %v794_v46 = vld [vmem:[#allocation2 + $0x20] sm:$0xff] (!%p1015_p11)  ;;  %v795_v49 = vld [vmem:[#allocation2 + $0x28] sm:$0xff] (!%p1015_p11) }
 0x299   : > { %v809_v48 = vadd.f32 (!%p1015_p11), %v1156_v26, %v793_v47  ;;  %v810_v50 = vadd.f32 (!%p1015_p11), %v794_v46, %v707_v29  ;;  %v811_v52 = vadd.f32 (!%p1015_p11), %v1159_v28, %v795_v49  ;;  %v796_v53 = vld [vmem:[#allocation2 + $0x30] sm:$0xff] (!%p1015_p11)  ;;  %v797_v54 = vld [vmem:[#allocation2 + $0x38] sm:$0xff] (!%p1015_p11)  ;;  %v798_v56 = vld [vmem:[#allocation2 + $0x40] sm:$0xff] (!%p1015_p11) }
 0x29a   : > { %822 = vst [vmem:[#allocation2] sm:$0xff] (!%p1015_p11), %v806_v43  ;;  %823 = vst [vmem:[#allocation2 + $0x8] sm:$0xff] (!%p1015_p11), %v807_v44  ;;  %v812_v51 = vadd.f32 (!%p1015_p11), %v796_v53, %v717_v31  ;;  %v813_v57 = vadd.f32 (!%p1015_p11), %v1162_v30, %v797_v54  ;;  %v814_v55 = vadd.f32 (!%p1015_p11), %v798_v56, %v727_v33  ;;  %v799_v59 = vld [vmem:[#allocation2 + $0x48] sm:$0xff] (!%p1015_p11)  ;;  %v800_v60 = vld [vmem:[#allocation2 + $0x50] sm:$0xff] (!%p1015_p11) }
 0x29b   : > { %824 = vst [vmem:[#allocation2 + $0x10] sm:$0xff] (!%p1015_p11), %v808_v45  ;;  %v801_v61 = vld [vmem:[#allocation2 + $0x58] sm:$0xff] (!%p1015_p11)  ;;  %825 = vst [vmem:[#allocation2 + $0x18] sm:$0xff] (!%p1015_p11), %v809_v48  ;;  %v815_v62 = vadd.f32 (!%p1015_p11), %v1165_v32, %v799_v59  ;;  %v816_v0 = vadd.f32 (!%p1015_p11), %v800_v60, %v737_v35  ;;  %v802_v1 = vld [vmem:[#allocation2 + $0x60] sm:$0xff] (!%p1015_p11) }
 0x29c   : > { %826 = vst [vmem:[#allocation2 + $0x20] sm:$0xff] (!%p1015_p11), %v810_v50  ;;  %827 = vst [vmem:[#allocation2 + $0x28] sm:$0xff] (!%p1015_p11), %v811_v52  ;;  %v817_v58 = vadd.f32 (!%p1015_p11), %v1168_v34, %v801_v61  ;;  %v803_v63 = vld [vmem:[#allocation2 + $0x68] sm:$0xff] (!%p1015_p11)  ;;  %v804_v2 = vld [vmem:[#allocation2 + $0x70] sm:$0xff] (!%p1015_p11)  ;;  %v818_v4 = vadd.f32 (!%p1015_p11), %v802_v1, %v747_v37 }
 0x29d   : > { %828 = vst [vmem:[#allocation2 + $0x30] sm:$0xff] (!%p1015_p11), %v812_v51  ;;  %829 = vst [vmem:[#allocation2 + $0x38] sm:$0xff] (!%p1015_p11), %v813_v57  ;;  %v819_v5 = vadd.f32 (!%p1015_p11), %v1171_v36, %v803_v63  ;;  %v820_v3 = vadd.f32 (!%p1015_p11), %v804_v2, %v757_v39  ;;  %v805_v6 = vld [vmem:[#allocation2 + $0x78] sm:$0xff] (!%p1015_p11) }
 0x29e   : > { %830 = vst [vmem:[#allocation2 + $0x40] sm:$0xff] (!%p1015_p11), %v814_v55  ;;  %831 = vst [vmem:[#allocation2 + $0x48] sm:$0xff] (!%p1015_p11), %v815_v62  ;;  %v821_v8 = vadd.f32 (!%p1015_p11), %v1816_v38, %v805_v6 }
 0x29f   : > { %832 = vst [vmem:[#allocation2 + $0x50] sm:$0xff] %v816_v0  ;;  %833 = vst [vmem:[#allocation2 + $0x58] sm:$0xff] %v817_v58 }
 0x2a0   : > { %834 = vst [vmem:[#allocation2 + $0x60] sm:$0xff] %v818_v4  ;;  %835 = vst [vmem:[#allocation2 + $0x68] sm:$0xff] %v819_v5 }
 0x2a1   : > { %836 = vst [vmem:[#allocation2 + $0x70] sm:$0xff] %v820_v3  ;;  %837 = vst [vmem:[#allocation2 + $0x78] sm:$0xff] %v821_v8 }
 0x2a2 PF: > { %p1016_p4 = scmp.ne.s32.totalorder %s1471_s15, 1 }
 0x2a4   : > { %841 = sbr.rel (%p1016_p4) target bundleno = 685 (0x2ad), region = 52  ;;  %v842_v9 = vld [vmem:[#allocation2] sm:$0xff] (!%p1016_p4)  ;;  %v843_v7 = vld [vmem:[#allocation2 + $0x8] sm:$0xff] (!%p1016_p4) }
 0x2a5   : > { %v844_v10 = vld [vmem:[#allocation2 + $0x10] sm:$0xff] (!%p1016_p4)  ;;  %858 = vst [vmem:[%s1892_s3] sm:$0xff] (!%p1016_p4), %v842_v9  ;;  %859 = vst [vmem:[%s1892_s3 + $0x8] sm:$0xff] (!%p1016_p4), %v843_v7  ;;  %v845_v12 = vld [vmem:[#allocation2 + $0x18] sm:$0xff] (!%p1016_p4) }
 0x2a6   : > { %860 = vst [vmem:[%s1892_s3 + $0x10] sm:$0xff] (!%p1016_p4), %v844_v10  ;;  %v846_v11 = vld [vmem:[#allocation2 + $0x20] sm:$0xff] (!%p1016_p4)  ;;  %v847_v13 = vld [vmem:[#allocation2 + $0x28] sm:$0xff] (!%p1016_p4)  ;;  %861 = vst [vmem:[%s1892_s3 + $0x18] sm:$0xff] (!%p1016_p4), %v845_v12 }
 0x2a7   : > { %862 = vst [vmem:[%s1892_s3 + $0x20] sm:$0xff] (!%p1016_p4), %v846_v11  ;;  %863 = vst [vmem:[%s1892_s3 + $0x28] sm:$0xff] (!%p1016_p4), %v847_v13  ;;  %v848_v14 = vld [vmem:[#allocation2 + $0x30] sm:$0xff] (!%p1016_p4)  ;;  %v849_v15 = vld [vmem:[#allocation2 + $0x38] sm:$0xff] (!%p1016_p4) }
 0x2a8   : > { %v850_v16 = vld [vmem:[#allocation2 + $0x40] sm:$0xff] (!%p1016_p4)  ;;  %864 = vst [vmem:[%s1892_s3 + $0x30] sm:$0xff] (!%p1016_p4), %v848_v14  ;;  %865 = vst [vmem:[%s1892_s3 + $0x38] sm:$0xff] (!%p1016_p4), %v849_v15  ;;  %v851_v17 = vld [vmem:[#allocation2 + $0x48] sm:$0xff] (!%p1016_p4) }
 0x2a9   : > { %866 = vst [vmem:[%s1892_s3 + $0x40] sm:$0xff] (!%p1016_p4), %v850_v16  ;;  %v852_v18 = vld [vmem:[#allocation2 + $0x50] sm:$0xff] (!%p1016_p4)  ;;  %v853_v19 = vld [vmem:[#allocation2 + $0x58] sm:$0xff] (!%p1016_p4)  ;;  %867 = vst [vmem:[%s1892_s3 + $0x48] sm:$0xff] (!%p1016_p4), %v851_v17 }
 0x2aa   : > { %868 = vst [vmem:[%s1892_s3 + $0x50] sm:$0xff] (!%p1016_p4), %v852_v18  ;;  %869 = vst [vmem:[%s1892_s3 + $0x58] sm:$0xff] (!%p1016_p4), %v853_v19  ;;  %v854_v20 = vld [vmem:[#allocation2 + $0x60] sm:$0xff] (!%p1016_p4)  ;;  %v855_v21 = vld [vmem:[#allocation2 + $0x68] sm:$0xff] (!%p1016_p4) }
 0x2ab   : > { %v856_v22 = vld [vmem:[#allocation2 + $0x70] sm:$0xff]  ;;  %870 = vst [vmem:[%s1892_s3 + $0x60] sm:$0xff] %v854_v20  ;;  %871 = vst [vmem:[%s1892_s3 + $0x68] sm:$0xff] %v855_v21  ;;  %v857_v23 = vld [vmem:[#allocation2 + $0x78] sm:$0xff] }
 0x2ac   : > { %872 = vst [vmem:[%s1892_s3 + $0x70] sm:$0xff] %v856_v22  ;;  %873 = vst [vmem:[%s1892_s3 + $0x78] sm:$0xff] %v857_v23 }
 0x2ad PF: > { %s19_s17 = sadd.s32 1, %s1479_s17   ;;  %s1899_s12 = smov %s1463_s13 }
 0x2ae   : > { %p16_p8 = scmp.ge.s32.totalorder %s19_s17, 4   ;;  %s1900_s13 = smov %s1467_s14 }
 0x2af   : > { %s1901_s14 = smov %s1554_s24  ;;  %s1902_s15 = smov %s1475_s16 }
 0x2b0   : > { %s1903_s16 = smov %s1905_s19  ;;  %18 = sbr.rel (!%p16_p8) target bundleno = 6 (0x6), region = 100 }
 0x2b7   :  { %896 = vsyncpa [#allocation4], 1 }
 0x2b8   :  { %898 = vsyncpa [#allocation4 + $0x1], 1 }
 0x2b9   :  { %899 = vsyncpa [#allocation6], 1 }
 0x2ba   :  { %901 = vsyncpa [#allocation6 + $0x1], 1 }

</bundles_post_ra>
